<compile_context>
chip_gen: v7x
topology: tpu7x:2x2x1
jax: 0.10.0
libtpu: 0.0.40
codegen_flags: <defaults>
</compile_context>

<pallas_src>
import math

import jax
import jax.numpy as jnp
from jax import lax
from jax.experimental import pallas as pl
from jax.experimental.pallas import tpu as pltpu


def _choose_head_group(num_heads, head_size):
    """Largest G dividing num_heads with G*hd a multiple of 128 and <= 512 lanes."""
    for g in range(num_heads, 0, -1):
        if num_heads % g:
            continue
        w = g * head_size
        if w % 128 == 0 and w <= 512:
            return g
    # Fallback (small models): take all heads -> lane width == hidden_size,
    # which equals the full array dim and is therefore always a legal,
    # lane-dense block.
    return num_heads


def _choose_q_tile(seq_len):
    if seq_len <= 256:
        return seq_len
    for tq in (256, 128, 64, 32, 16, 8):
        if seq_len % tq == 0:
            return tq
    return seq_len


def mha_kernel(x_ref, w_ref, b_ref, ctx_ref, probs_ref, qkv_ref):
    """One (batch, head-group, q-tile) triple per grid step.

    x_ref:     (1, sl, hs)      VMEM bf16, resident across (group, q-tile)
    w_ref:     (1, hs, 3*W)     VMEM bf16  fused [Wq(scaled)|Wk|Wv] group slice
    b_ref:     (1, 1, 3*W)      VMEM f32   fused [bq(scaled)|bk|bv]
    ctx_ref:   (1, tq, W)       VMEM out f32, written in final (bs, sl, hs) layout
    probs_ref: (1, G, tq, sl)   VMEM out bf16
    qkv_ref:   (sl, 3*W)        VMEM scratch bf16, fused projection for this group
    """
    t = pl.program_id(2)

    tq = ctx_ref.shape[1]
    width = ctx_ref.shape[2]          # W = G * hd
    n_heads_g = probs_ref.shape[1]    # G
    hd = width // n_heads_g

    # Fused Q/K/V projection for the whole group, once per (batch, group);
    # reused across all q tiles via VMEM scratch.  f32 accumulate + bias,
    # stored bf16 for the MXU attention matmuls.
    @pl.when(t == 0)
    def _():
        qkv = jnp.dot(x_ref[0], w_ref[0],
                      preferred_element_type=jnp.float32) + b_ref[0]
        qkv_ref[...] = qkv.astype(jnp.bfloat16)

    row0 = pl.multiple_of(t * tq, tq)

    # TODO(synk): optional `attn_masks` additive masking not implemented
    # (module default is attn_masks=None).
    # TODO(synk): nn.Dropout(0.5) on attn_probs is stochastic in training mode;
    # eval-mode (identity) semantics are implemented here.
    for h in range(n_heads_g):
        qh = qkv_ref[pl.ds(row0, tq), pl.ds(h * hd, hd)]                  # (tq, hd)
        kh = qkv_ref[:, pl.ds(width + h * hd, hd)]                        # (sl, hd)
        vh = qkv_ref[:, pl.ds(2 * width + h * hd, hd)]                    # (sl, hd)

        # Scaled scores (scale pre-folded into Wq/bq); contract on head dim.
        scores = lax.dot_general(qh, kh, (((1,), (1,)), ((), ())),
                                 preferred_element_type=jnp.float32)      # (tq, sl)

        # Softmax in f32; reciprocal on the EUP slot.
        m = jnp.max(scores, axis=-1, keepdims=True)
        e = jnp.exp(scores - m)
        p = e * pl.reciprocal(jnp.sum(e, axis=-1, keepdims=True), approx=True)
        p_bf = p.astype(jnp.bfloat16)

        probs_ref[0, h] = p_bf
        ctx_ref[0, :, pl.ds(h * hd, hd)] = jnp.dot(
            p_bf, vh, preferred_element_type=jnp.float32)


def multi_head_attention(x, wq, bq, wk, bk, wv, bv, *, num_heads):
    """x: (bs, sl, hs); w*: (hs, hs) stored so y = x @ W + b; b*: (hs,).

    Returns (context (bs, sl, hs) f32, attn_probs (bs, num_heads, sl, sl) bf16).
    """
    bs, sl, hs = x.shape
    assert hs % num_heads == 0
    hd = hs // num_heads
    scale = 1.0 / math.sqrt(hd)

    G = _choose_head_group(num_heads, hd)     # heads per grid step
    ng = num_heads // G                       # head groups
    W = G * hd                                # group lane width
    tq = _choose_q_tile(sl)
    nqt = sl // tq

    # Fused, head-group-major weights: (ng, hs, 3*W) = [Wq(scaled) | Wk | Wv].
    def to_groups(w):                         # (hs, hs) -> (ng, hs, W)
        return jnp.transpose(w.reshape(hs, ng, W), (1, 0, 2))

    wqkv = jnp.concatenate(
        [to_groups(wq * scale), to_groups(wk), to_groups(wv)],
        axis=-1).astype(jnp.bfloat16)                         # (ng, hs, 3W)
    bqkv = jnp.concatenate(
        [(bq * scale).reshape(ng, 1, W),
         bk.reshape(ng, 1, W),
         bv.reshape(ng, 1, W)],
        axis=-1).astype(jnp.float32)                          # (ng, 1, 3W)

    x_bf = x.astype(jnp.bfloat16)

    # Explicit VMEM budget: double-buffered in/out blocks + scratch, 2x margin.
    x_bytes = sl * hs * 2
    w_bytes = hs * 3 * W * 2
    b_bytes = 3 * W * 4
    ctx_bytes = tq * W * 4
    probs_bytes = G * tq * sl * 2
    scratch_bytes = sl * 3 * W * 2
    est = 2 * (x_bytes + w_bytes + b_bytes + ctx_bytes + probs_bytes) + scratch_bytes
    vmem_limit = int(min(64 << 20, max(2 * est + (1 << 20), 32 << 20)))

    grid = (bs, ng, nqt)
    grid_spec = pltpu.PrefetchScalarGridSpec(
        num_scalar_prefetch=0,
        grid=grid,
        in_specs=[
            pl.BlockSpec((1, sl, hs), lambda b, g, t: (b, 0, 0)),      # x (resident)
            pl.BlockSpec((1, hs, 3 * W), lambda b, g, t: (g, 0, 0)),   # fused W
            pl.BlockSpec((1, 1, 3 * W), lambda b, g, t: (g, 0, 0)),    # fused b
        ],
        out_specs=[
            # Context written directly in final (bs, sl, hs) layout, lane-dense.
            pl.BlockSpec((1, tq, W), lambda b, g, t: (b, t, g)),
            pl.BlockSpec((1, G, tq, sl), lambda b, g, t: (b, g, t, 0)),
        ],
        scratch_shapes=[pltpu.VMEM((sl, 3 * W), jnp.bfloat16)],        # fused QKV
    )

    out_shapes = (
        jax.ShapeDtypeStruct((bs, sl, hs), jnp.float32),
        jax.ShapeDtypeStruct((bs, num_heads, sl, sl), jnp.bfloat16),
    )

    ctx, probs = pl.pallas_call(
        mha_kernel,
        out_shape=out_shapes,
        grid_spec=grid_spec,
        compiler_params=pltpu.CompilerParams(
            dimension_semantics=("parallel", "arbitrary", "arbitrary"),
            vmem_limit_bytes=vmem_limit),
    )(x_bf, wqkv, bqkv)

    return ctx, probs


def reference_mha(x, wq, bq, wk, bk, wv, bv, *, num_heads):
    """Pure-JAX f32 reference mirroring the PyTorch forward (eval mode, no mask)."""
    bs, sl, hs = x.shape
    hd = hs // num_heads

    def proj(w, b):
        y = jnp.einsum('bsh,hd->bsd', x, w) + b
        return y.reshape(bs, sl, num_heads, hd).transpose(0, 2, 1, 3)

    q = proj(wq, bq)
    k = proj(wk, bk)
    v = proj(wv, bv)
    scores = jnp.einsum('bnqd,bnkd->bnqk', q, k) / math.sqrt(hd)
    probs = jax.nn.softmax(scores, axis=-1)
    ctx = jnp.einsum('bnqk,bnkd->bnqd', probs, v)
    ctx = ctx.transpose(0, 2, 1, 3).reshape(bs, sl, hs)
    return ctx, probs


if __name__ == "__main__":
    hidden_size = 32
    num_heads = 4
    bs, sl = 2, 8

    key = jax.random.PRNGKey(0)
    kx, kwq, kbq, kwk, kbk, kwv, kbv = jax.random.split(key, 7)

    bound = 1.0 / math.sqrt(hidden_size)  # matches nn.Linear init range
    x = jax.random.normal(kx, (bs, sl, hidden_size), dtype=jnp.float32)
    # Weights stored so that y = x @ W + b (i.e. W = torch weight transposed).
    wq = jax.random.uniform(kwq, (hidden_size, hidden_size), jnp.float32, -bound, bound)
    wk = jax.random.uniform(kwk, (hidden_size, hidden_size), jnp.float32, -bound, bound)
    wv = jax.random.uniform(kwv, (hidden_size, hidden_size), jnp.float32, -bound, bound)
    bq = jax.random.uniform(kbq, (hidden_size,), jnp.float32, -bound, bound)
    bk = jax.random.uniform(kbk, (hidden_size,), jnp.float32, -bound, bound)
    bv = jax.random.uniform(kbv, (hidden_size,), jnp.float32, -bound, bound)

    ctx, probs = multi_head_attention(x, wq, bq, wk, bk, wv, bv,
                                      num_heads=num_heads)
    jax.block_until_ready((ctx, probs))

    ctx_ref, probs_ref = reference_mha(x, wq, bq, wk, bk, wv, bv,
                                       num_heads=num_heads)
    # bf16 MXU operands + bf16 probs + approx reciprocal -> loosened tolerances.
    assert jnp.allclose(ctx, ctx_ref, atol=3e-2, rtol=3e-2)
    assert jnp.allclose(probs.astype(jnp.float32), probs_ref, atol=2e-2, rtol=2e-2)

    print("KERNEL_OK")
</pallas_src>

<mosaic_0001>
module attributes {stable_mosaic.version = 11 : i64} {
  func.func @mha_kernel(%arg0: i32, %arg1: i32, %arg2: i32, %arg3: memref<1x8x32xbf16, #tpu.memory_space<vmem>>, %arg4: memref<1x32x96xbf16, #tpu.memory_space<vmem>>, %arg5: memref<1x1x96xf32, #tpu.memory_space<vmem>>, %arg6: memref<1x8x32xf32, #tpu.memory_space<vmem>>, %arg7: memref<1x4x8x8xbf16, #tpu.memory_space<vmem>>, %arg8: memref<8x96xbf16, #tpu.memory_space<vmem>>) attributes {dimension_semantics = [#tpu.dimension_semantics<parallel>, #tpu.dimension_semantics<arbitrary>, #tpu.dimension_semantics<arbitrary>], iteration_bounds = array<i64: 2, 1, 1>, scalar_prefetch = 0 : i64, scratch_operands = 1 : i64, tpu.core_type = #tpu.core_type<tc>, window_params = [{transform_indices = @transform_0, window_bounds = array<i64: 1, 8, 32>}, {transform_indices = @transform_1, window_bounds = array<i64: 1, 32, 96>}, {transform_indices = @transform_2, window_bounds = array<i64: 1, 1, 96>}, {transform_indices = @transform_3, window_bounds = array<i64: 1, 8, 32>}, {transform_indices = @transform_4, window_bounds = array<i64: 1, 4, 8, 8>}]} {
    %c0_i32 = arith.constant 0 : i32
    %0 = arith.cmpi eq, %arg2, %c0_i32 : i32
    %1 = arith.extui %0 : i1 to i32
    %c0_i32_0 = arith.constant 0 : i32
    %2 = arith.cmpi ne, %1, %c0_i32_0 : i32
    scf.if %2 {
      %c0_49 = arith.constant 0 : index
      %c0_50 = arith.constant 0 : index
      %c0_51 = arith.constant 0 : index
      %97 = vector.load %arg3[%c0_49, %c0_50, %c0_51] : memref<1x8x32xbf16, #tpu.memory_space<vmem>>, vector<1x8x32xbf16>
      %98 = vector.shape_cast %97 : vector<1x8x32xbf16> to vector<8x32xbf16>
      %c0_52 = arith.constant 0 : index
      %c0_53 = arith.constant 0 : index
      %c0_54 = arith.constant 0 : index
      %99 = vector.load %arg4[%c0_52, %c0_53, %c0_54] : memref<1x32x96xbf16, #tpu.memory_space<vmem>>, vector<1x32x96xbf16>
      %100 = vector.shape_cast %99 : vector<1x32x96xbf16> to vector<32x96xbf16>
      %cst_55 = arith.constant dense<0.000000e+00> : vector<8x96xf32>
      %101 = tpu.matmul %98, %100, %cst_55 {dimension_numbers = #tpu.dot_dimension_numbers<[1], [0], [0], [1], [0, 0, 1, 1], [], []>} : vector<8x32xbf16>, vector<32x96xbf16>, vector<8x96xf32> -> vector<8x96xf32>
      %c0_56 = arith.constant 0 : index
      %c0_57 = arith.constant 0 : index
      %c0_58 = arith.constant 0 : index
      %102 = vector.load %arg5[%c0_56, %c0_57, %c0_58] : memref<1x1x96xf32, #tpu.memory_space<vmem>>, vector<1x1x96xf32>
      %103 = vector.shape_cast %102 : vector<1x1x96xf32> to vector<1x96xf32>
      %104 = vector.broadcast %103 : vector<1x96xf32> to vector<8x96xf32>
      %105 = arith.addf %101, %104 : vector<8x96xf32>
      %106 = arith.truncf %105 : vector<8x96xf32> to vector<8x96xbf16>
      %c0_59 = arith.constant 0 : index
      %c0_60 = arith.constant 0 : index
      %107 = vector.load %arg8[%c0_59, %c0_60] : memref<8x96xbf16, #tpu.memory_space<vmem>>, vector<8x96xbf16>
      tpu.vector_store %arg8[%c0_59, %c0_60], %106 {strides = array<i32>} : memref<8x96xbf16, #tpu.memory_space<vmem>>, vector<8x96xbf16>,
    } else {
    }
    %c8_i32 = arith.constant 8 : i32
    %3 = arith.muli %arg2, %c8_i32 : i32
    %4 = tpu.assume_multiple %3, 8 : i32
    %5 = arith.index_cast %4 : i32 to index
    %c0 = arith.constant 0 : index
    %6 = vector.load %arg8[%5, %c0] : memref<8x96xbf16, #tpu.memory_space<vmem>>, vector<8x8xbf16>
    %c0_1 = arith.constant 0 : index
    %c32 = arith.constant 32 : index
    %7 = vector.load %arg8[%c0_1, %c32] : memref<8x96xbf16, #tpu.memory_space<vmem>>, vector<8x8xbf16>
    %c0_2 = arith.constant 0 : index
    %c64 = arith.constant 64 : index
    %8 = vector.load %arg8[%c0_2, %c64] : memref<8x96xbf16, #tpu.memory_space<vmem>>, vector<8x8xbf16>
    %cst = arith.constant dense<0.000000e+00> : vector<8x8xf32>
    %9 = tpu.matmul %6, %7, %cst {dimension_numbers = #tpu.dot_dimension_numbers<[1], [1], [0], [0], [0, 0, 1, 0], [], []>} : vector<8x8xbf16>, vector<8x8xbf16>, vector<8x8xf32> -> vector<8x8xf32>
    %cst_3 = arith.constant dense<0xFF800000> : vector<8xf32>
    %10 = vector.multi_reduction <maximumf>, %9, %cst_3 [1] : vector<8x8xf32> to vector<8xf32>
    %11 = vector.shape_cast %10 : vector<8xf32> to vector<8x1xf32>
    %12 = vector.broadcast %11 : vector<8x1xf32> to vector<8x8xf32>
    %13 = arith.subf %9, %12 : vector<8x8xf32>
    %14 = math.exp %13 : vector<8x8xf32>
    %cst_4 = arith.constant dense<0.000000e+00> : vector<8xf32>
    %15 = vector.multi_reduction <add>, %14, %cst_4 [1] : vector<8x8xf32> to vector<8xf32>
    %16 = vector.shape_cast %15 : vector<8xf32> to vector<8x1xf32>
    %17 = tpu.reciprocal %16 {approx = true} : vector<8x1xf32> -> vector<8x1xf32>
    %18 = vector.broadcast %17 : vector<8x1xf32> to vector<8x8xf32>
    %19 = arith.mulf %14, %18 : vector<8x8xf32>
    %20 = arith.truncf %19 : vector<8x8xf32> to vector<8x8xbf16>
    %c0_5 = arith.constant 0 : index
    %c0_6 = arith.constant 0 : index
    %c0_7 = arith.constant 0 : index
    %c0_8 = arith.constant 0 : index
    %21 = vector.load %arg7[%c0_5, %c0_6, %c0_7, %c0_8] : memref<1x4x8x8xbf16, #tpu.memory_space<vmem>>, vector<1x1x8x8xbf16>
    %22 = vector.shape_cast %21 : vector<1x1x8x8xbf16> to vector<8x8xbf16>
    %23 = vector.shape_cast %20 : vector<8x8xbf16> to vector<1x1x8x8xbf16>
    tpu.vector_store %arg7[%c0_5, %c0_6, %c0_7, %c0_8], %23 {strides = array<i32>} : memref<1x4x8x8xbf16, #tpu.memory_space<vmem>>, vector<1x1x8x8xbf16>,
    %cst_9 = arith.constant dense<0.000000e+00> : vector<8x8xf32>
    %24 = tpu.matmul %20, %8, %cst_9 {dimension_numbers = #tpu.dot_dimension_numbers<[1], [0], [0], [1], [0, 0, 1, 1], [], []>} : vector<8x8xbf16>, vector<8x8xbf16>, vector<8x8xf32> -> vector<8x8xf32>
    %c0_10 = arith.constant 0 : index
    %c0_11 = arith.constant 0 : index
    %c0_12 = arith.constant 0 : index
    %25 = vector.load %arg6[%c0_10, %c0_11, %c0_12] : memref<1x8x32xf32, #tpu.memory_space<vmem>>, vector<1x8x8xf32>
    %26 = vector.shape_cast %25 : vector<1x8x8xf32> to vector<8x8xf32>
    %27 = vector.shape_cast %24 : vector<8x8xf32> to vector<1x8x8xf32>
    tpu.vector_store %arg6[%c0_10, %c0_11, %c0_12], %27 {strides = array<i32>} : memref<1x8x32xf32, #tpu.memory_space<vmem>>, vector<1x8x8xf32>,
    %28 = arith.index_cast %4 : i32 to index
    %c8 = arith.constant 8 : index
    %29 = vector.load %arg8[%28, %c8] : memref<8x96xbf16, #tpu.memory_space<vmem>>, vector<8x8xbf16>
    %c0_13 = arith.constant 0 : index
    %c40 = arith.constant 40 : index
    %30 = vector.load %arg8[%c0_13, %c40] : memref<8x96xbf16, #tpu.memory_space<vmem>>, vector<8x8xbf16>
    %c0_14 = arith.constant 0 : index
    %c72 = arith.constant 72 : index
    %31 = vector.load %arg8[%c0_14, %c72] : memref<8x96xbf16, #tpu.memory_space<vmem>>, vector<8x8xbf16>
    %cst_15 = arith.constant dense<0.000000e+00> : vector<8x8xf32>
    %32 = tpu.matmul %29, %30, %cst_15 {dimension_numbers = #tpu.dot_dimension_numbers<[1], [1], [0], [0], [0, 0, 1, 0], [], []>} : vector<8x8xbf16>, vector<8x8xbf16>, vector<8x8xf32> -> vector<8x8xf32>
    %cst_16 = arith.constant dense<0xFF800000> : vector<8xf32>
    %33 = vector.multi_reduction <maximumf>, %32, %cst_16 [1] : vector<8x8xf32> to vector<8xf32>
    %34 = vector.shape_cast %33 : vector<8xf32> to vector<8x1xf32>
    %35 = vector.broadcast %34 : vector<8x1xf32> to vector<8x8xf32>
    %36 = arith.subf %32, %35 : vector<8x8xf32>
    %37 = math.exp %36 : vector<8x8xf32>
    %cst_17 = arith.constant dense<0.000000e+00> : vector<8xf32>
    %38 = vector.multi_reduction <add>, %37, %cst_17 [1] : vector<8x8xf32> to vector<8xf32>
    %39 = vector.shape_cast %38 : vector<8xf32> to vector<8x1xf32>
    %40 = tpu.reciprocal %39 {approx = true} : vector<8x1xf32> -> vector<8x1xf32>
    %41 = vector.broadcast %40 : vector<8x1xf32> to vector<8x8xf32>
    %42 = arith.mulf %37, %41 : vector<8x8xf32>
    %43 = arith.truncf %42 : vector<8x8xf32> to vector<8x8xbf16>
    %c0_18 = arith.constant 0 : index
    %c1 = arith.constant 1 : index
    %c0_19 = arith.constant 0 : index
    %c0_20 = arith.constant 0 : index
    %44 = vector.load %arg7[%c0_18, %c1, %c0_19, %c0_20] : memref<1x4x8x8xbf16, #tpu.memory_space<vmem>>, vector<1x1x8x8xbf16>
    %45 = vector.shape_cast %44 : vector<1x1x8x8xbf16> to vector<8x8xbf16>
    %46 = vector.shape_cast %43 : vector<8x8xbf16> to vector<1x1x8x8xbf16>
    tpu.vector_store %arg7[%c0_18, %c1, %c0_19, %c0_20], %46 {strides = array<i32>} : memref<1x4x8x8xbf16, #tpu.memory_space<vmem>>, vector<1x1x8x8xbf16>,
    %cst_21 = arith.constant dense<0.000000e+00> : vector<8x8xf32>
    %47 = tpu.matmul %43, %31, %cst_21 {dimension_numbers = #tpu.dot_dimension_numbers<[1], [0], [0], [1], [0, 0, 1, 1], [], []>} : vector<8x8xbf16>, vector<8x8xbf16>, vector<8x8xf32> -> vector<8x8xf32>
    %c0_22 = arith.constant 0 : index
    %c0_23 = arith.constant 0 : index
    %c8_24 = arith.constant 8 : index
    %48 = vector.load %arg6[%c0_22, %c0_23, %c8_24] : memref<1x8x32xf32, #tpu.memory_space<vmem>>, vector<1x8x8xf32>
    %49 = vector.shape_cast %48 : vector<1x8x8xf32> to vector<8x8xf32>
    %50 = vector.shape_cast %47 : vector<8x8xf32> to vector<1x8x8xf32>
    tpu.vector_store %arg6[%c0_22, %c0_23, %c8_24], %50 {strides = array<i32>} : memref<1x8x32xf32, #tpu.memory_space<vmem>>, vector<1x8x8xf32>,
    %51 = arith.index_cast %4 : i32 to index
    %c16 = arith.constant 16 : index
    %52 = vector.load %arg8[%51, %c16] : memref<8x96xbf16, #tpu.memory_space<vmem>>, vector<8x8xbf16>
    %c0_25 = arith.constant 0 : index
    %c48 = arith.constant 48 : index
    %53 = vector.load %arg8[%c0_25, %c48] : memref<8x96xbf16, #tpu.memory_space<vmem>>, vector<8x8xbf16>
    %c0_26 = arith.constant 0 : index
    %c80 = arith.constant 80 : index
    %54 = vector.load %arg8[%c0_26, %c80] : memref<8x96xbf16, #tpu.memory_space<vmem>>, vector<8x8xbf16>
    %cst_27 = arith.constant dense<0.000000e+00> : vector<8x8xf32>
    %55 = tpu.matmul %52, %53, %cst_27 {dimension_numbers = #tpu.dot_dimension_numbers<[1], [1], [0], [0], [0, 0, 1, 0], [], []>} : vector<8x8xbf16>, vector<8x8xbf16>, vector<8x8xf32> -> vector<8x8xf32>
    %cst_28 = arith.constant dense<0xFF800000> : vector<8xf32>
    %56 = vector.multi_reduction <maximumf>, %55, %cst_28 [1] : vector<8x8xf32> to vector<8xf32>
    %57 = vector.shape_cast %56 : vector<8xf32> to vector<8x1xf32>
    %58 = vector.broadcast %57 : vector<8x1xf32> to vector<8x8xf32>
    %59 = arith.subf %55, %58 : vector<8x8xf32>
    %60 = math.exp %59 : vector<8x8xf32>
    %cst_29 = arith.constant dense<0.000000e+00> : vector<8xf32>
    %61 = vector.multi_reduction <add>, %60, %cst_29 [1] : vector<8x8xf32> to vector<8xf32>
    %62 = vector.shape_cast %61 : vector<8xf32> to vector<8x1xf32>
    %63 = tpu.reciprocal %62 {approx = true} : vector<8x1xf32> -> vector<8x1xf32>
    %64 = vector.broadcast %63 : vector<8x1xf32> to vector<8x8xf32>
    %65 = arith.mulf %60, %64 : vector<8x8xf32>
    %66 = arith.truncf %65 : vector<8x8xf32> to vector<8x8xbf16>
    %c0_30 = arith.constant 0 : index
    %c2 = arith.constant 2 : index
    %c0_31 = arith.constant 0 : index
    %c0_32 = arith.constant 0 : index
    %67 = vector.load %arg7[%c0_30, %c2, %c0_31, %c0_32] : memref<1x4x8x8xbf16, #tpu.memory_space<vmem>>, vector<1x1x8x8xbf16>
    %68 = vector.shape_cast %67 : vector<1x1x8x8xbf16> to vector<8x8xbf16>
    %69 = vector.shape_cast %66 : vector<8x8xbf16> to vector<1x1x8x8xbf16>
    tpu.vector_store %arg7[%c0_30, %c2, %c0_31, %c0_32], %69 {strides = array<i32>} : memref<1x4x8x8xbf16, #tpu.memory_space<vmem>>, vector<1x1x8x8xbf16>,
    %cst_33 = arith.constant dense<0.000000e+00> : vector<8x8xf32>
    %70 = tpu.matmul %66, %54, %cst_33 {dimension_numbers = #tpu.dot_dimension_numbers<[1], [0], [0], [1], [0, 0, 1, 1], [], []>} : vector<8x8xbf16>, vector<8x8xbf16>, vector<8x8xf32> -> vector<8x8xf32>
    %c0_34 = arith.constant 0 : index
    %c0_35 = arith.constant 0 : index
    %c16_36 = arith.constant 16 : index
    %71 = vector.load %arg6[%c0_34, %c0_35, %c16_36] : memref<1x8x32xf32, #tpu.memory_space<vmem>>, vector<1x8x8xf32>
    %72 = vector.shape_cast %71 : vector<1x8x8xf32> to vector<8x8xf32>
    %73 = vector.shape_cast %70 : vector<8x8xf32> to vector<1x8x8xf32>
    tpu.vector_store %arg6[%c0_34, %c0_35, %c16_36], %73 {strides = array<i32>} : memref<1x8x32xf32, #tpu.memory_space<vmem>>, vector<1x8x8xf32>,
    %74 = arith.index_cast %4 : i32 to index
    %c24 = arith.constant 24 : index
    %75 = vector.load %arg8[%74, %c24] : memref<8x96xbf16, #tpu.memory_space<vmem>>, vector<8x8xbf16>
    %c0_37 = arith.constant 0 : index
    %c56 = arith.constant 56 : index
    %76 = vector.load %arg8[%c0_37, %c56] : memref<8x96xbf16, #tpu.memory_space<vmem>>, vector<8x8xbf16>
    %c0_38 = arith.constant 0 : index
    %c88 = arith.constant 88 : index
    %77 = vector.load %arg8[%c0_38, %c88] : memref<8x96xbf16, #tpu.memory_space<vmem>>, vector<8x8xbf16>
    %cst_39 = arith.constant dense<0.000000e+00> : vector<8x8xf32>
    %78 = tpu.matmul %75, %76, %cst_39 {dimension_numbers = #tpu.dot_dimension_numbers<[1], [1], [0], [0], [0, 0, 1, 0], [], []>} : vector<8x8xbf16>, vector<8x8xbf16>, vector<8x8xf32> -> vector<8x8xf32>
    %cst_40 = arith.constant dense<0xFF800000> : vector<8xf32>
    %79 = vector.multi_reduction <maximumf>, %78, %cst_40 [1] : vector<8x8xf32> to vector<8xf32>
    %80 = vector.shape_cast %79 : vector<8xf32> to vector<8x1xf32>
    %81 = vector.broadcast %80 : vector<8x1xf32> to vector<8x8xf32>
    %82 = arith.subf %78, %81 : vector<8x8xf32>
    %83 = math.exp %82 : vector<8x8xf32>
    %cst_41 = arith.constant dense<0.000000e+00> : vector<8xf32>
    %84 = vector.multi_reduction <add>, %83, %cst_41 [1] : vector<8x8xf32> to vector<8xf32>
    %85 = vector.shape_cast %84 : vector<8xf32> to vector<8x1xf32>
    %86 = tpu.reciprocal %85 {approx = true} : vector<8x1xf32> -> vector<8x1xf32>
    %87 = vector.broadcast %86 : vector<8x1xf32> to vector<8x8xf32>
    %88 = arith.mulf %83, %87 : vector<8x8xf32>
    %89 = arith.truncf %88 : vector<8x8xf32> to vector<8x8xbf16>
    %c0_42 = arith.constant 0 : index
    %c3 = arith.constant 3 : index
    %c0_43 = arith.constant 0 : index
    %c0_44 = arith.constant 0 : index
    %90 = vector.load %arg7[%c0_42, %c3, %c0_43, %c0_44] : memref<1x4x8x8xbf16, #tpu.memory_space<vmem>>, vector<1x1x8x8xbf16>
    %91 = vector.shape_cast %90 : vector<1x1x8x8xbf16> to vector<8x8xbf16>
    %92 = vector.shape_cast %89 : vector<8x8xbf16> to vector<1x1x8x8xbf16>
    tpu.vector_store %arg7[%c0_42, %c3, %c0_43, %c0_44], %92 {strides = array<i32>} : memref<1x4x8x8xbf16, #tpu.memory_space<vmem>>, vector<1x1x8x8xbf16>,
    %cst_45 = arith.constant dense<0.000000e+00> : vector<8x8xf32>
    %93 = tpu.matmul %89, %77, %cst_45 {dimension_numbers = #tpu.dot_dimension_numbers<[1], [0], [0], [1], [0, 0, 1, 1], [], []>} : vector<8x8xbf16>, vector<8x8xbf16>, vector<8x8xf32> -> vector<8x8xf32>
    %c0_46 = arith.constant 0 : index
    %c0_47 = arith.constant 0 : index
    %c24_48 = arith.constant 24 : index
    %94 = vector.load %arg6[%c0_46, %c0_47, %c24_48] : memref<1x8x32xf32, #tpu.memory_space<vmem>>, vector<1x8x8xf32>
    %95 = vector.shape_cast %94 : vector<1x8x8xf32> to vector<8x8xf32>
    %96 = vector.shape_cast %93 : vector<8x8xf32> to vector<1x8x8xf32>
    tpu.vector_store %arg6[%c0_46, %c0_47, %c24_48], %96 {strides = array<i32>} : memref<1x8x32xf32, #tpu.memory_space<vmem>>, vector<1x8x8xf32>,
    return
  }
  func.func @transform_0(%arg0: i32, %arg1: i32, %arg2: i32) -> (i32, i32, i32) {
    %c0_i32 = arith.constant 0 : i32
    %c0_i32_0 = arith.constant 0 : i32
    %c0_i32_1 = arith.constant 0 : i32
    return %arg0, %c0_i32, %c0_i32_0 : i32, i32, i32
  }
  func.func @transform_1(%arg0: i32, %arg1: i32, %arg2: i32) -> (i32, i32, i32) {
    %c0_i32 = arith.constant 0 : i32
    %c0_i32_0 = arith.constant 0 : i32
    %c0_i32_1 = arith.constant 0 : i32
    return %arg1, %c0_i32, %c0_i32_0 : i32, i32, i32
  }
  func.func @transform_2(%arg0: i32, %arg1: i32, %arg2: i32) -> (i32, i32, i32) {
    %c0_i32 = arith.constant 0 : i32
    %c0_i32_0 = arith.constant 0 : i32
    %c0_i32_1 = arith.constant 0 : i32
    return %arg1, %c0_i32, %c0_i32_0 : i32, i32, i32
  }
  func.func @transform_3(%arg0: i32, %arg1: i32, %arg2: i32) -> (i32, i32, i32) {
    %c0_i32 = arith.constant 0 : i32
    return %arg0, %arg2, %arg1 : i32, i32, i32
  }
  func.func @transform_4(%arg0: i32, %arg1: i32, %arg2: i32) -> (i32, i32, i32, i32) {
    %c0_i32 = arith.constant 0 : i32
    %c0_i32_0 = arith.constant 0 : i32
    return %arg0, %arg1, %arg2, %c0_i32 : i32, i32, i32, i32
  }
}

</mosaic_0001>

<bundles_post_ra>
// kernel: tpu_custom_call.1
= control target key start
LH: loop header
LB: loop body
LE: loop exit
PB: predicated region body
PF: predicated region fallthrough
CT: control target
= control target key end

     0   :  { %10 = vsyncpa [#allocation4], 0  ;;  %s1858_s0 = inlined_call_operand.hbm [shape: bf16[2,8,32], index: 0, kind: input, shape index: {}]   ;;  %s1859_s1 = inlined_call_operand.hbm [shape: bf16[1,32,96], index: 1, kind: input, shape index: {}]   ;;  %s1860_s2 = inlined_call_operand.vmem [shape: f32[1,1,96], index: 2, kind: input, shape index: {}]   ;;  %s1861_s3 = inlined_call_operand.hbm [shape: f32[2,8,32], index: 3, kind: output, shape index: {0}]   ;;  %s1862_s4 = inlined_call_operand.hbm [shape: bf16[2,4,8,8], index: 4, kind: output, shape index: {1}]  }
   0x1   :  { %12 = vsyncpa [#allocation4 + $0x1], 0 }
   0x2   :  { %13 = vsyncpa [#allocation7], 0 }
   0x3   :  { %14 = vsyncpa [#allocation5], 0 }
   0x4   :  { %16 = vsyncpa [#allocation5 + $0x1], 0 }
   0x5   :  { %17 = vsyncpa [#allocation10], 0 }
   0x6   :  { %19 = vsyncpa [#allocation10 + $0x1], 0  ;;  %s1517_s15 = smov 0   ;;  %s1519_s16 = smov 0  }
   0x7   :  { %s1521_s17 = smov 0   ;;  %s1523_s18 = smov 0  }
   0x8   :  { %s1525_s19 = smov 0   ;;  %s1527_s20 = smov 0  }
   0x9 LB: > { %s1051_s21 = sadd.s32 4294967295, %s1467_s20   ;;  %s1052_s22 = sadd.s32 4294967294, %s1467_s20   ;;  %s1467_s20 = sphi %s1527_s20, %s25_s20   ;;  %s1463_s19 = sphi %s1525_s19, %s1886_s19   ;;  %s1459_s18 = sphi %s1523_s18, %s1885_s18   ;;  %s1455_s17 = sphi %s1521_s17, %s1884_s17   ;;  %s1451_s16 = sphi %s1519_s16, %s1883_s16   ;;  %s1447_s15 = sphi %s1517_s15, %s1882_s15  }
   0xa   : > { %p64_p0 = scmp.ne.s32.totalorder %s1451_s16, %s1447_s15  ;;  %p1551_p1 = scmp.eq.s32.totalorder %s1051_s21, 0 }
   0xb   : > { %p1555_p2 = scmp.eq.s32.totalorder %s1051_s21, 1  ;;  %p150_p3 = scmp.eq.s32.totalorder %s1052_s22, 1 }
   0xc   : > { %s1867_s23 = scalar_select %p1551_p1, 1, 0 }
   0xd   : > { %s1868_s24 = scalar_select %p1555_p2, 1, 0 }
   0xe   : > { %p1561_p4 = por %p1551_p1, %p64_p0  ;;  %p1053_p5 = scmp.ge.s32.totalorder %s1467_s20, 1 }
   0xf   : > { %p1566_p6 = por %p150_p3, %p64_p0  ;;  %p187_p7 = scmp.lt.s32.totalorder %s1467_s20, 3 }
  0x10   : > { %s1869_s25 = scalar_select %p1561_p4, 1, 0 }
  0x11   : > { %s1870_s26 = scalar_select %p1566_p6, 1, 0 }
  0x12   : > { %p1571_p8 = pnand %p1053_p5, %p187_p7  ;;  %s1469_s28 = smov [#allocation6]  }
  0x13   : > { %s202_s29 = sshll.u32 %s1469_s28, 4  ;;  %s44_s5 = sadd.s32 1, %s1463_s19  ;;  %s203_s29 = int_to_ptr.vmem [resolvable:$true] %s202_s29 }
  0x14   : > { %s1871_s27 = scalar_select %p1571_p8, 1, 0 }
  0x15   : > { %p1179_p9 = pneg %p1571_p8  ;;  %s1291_s8 = scalar_lea.hbm %s1859_s1, 256 }
  0x16   : > { %p1292_p12 = scmp.ne.s32.totalorder %s1859_s1, %s1291_s8  ;;  %p1298_p5 = scmp.lt.u32.totalorder %s1291_s8, %s1859_s1 }
  0x17   : > { %p1580_p11 = pnand %p1179_p9, %p1551_p1 }
  0x19   : > { %p1293_p13 = pneg %p1580_p11 }
  0x1b   : > { %p1294_p0 = pnand %p1293_p13, %p1292_p12 }
  0x1d   : > { %p1295_p3 = pneg %p1294_p0 }
  0x1f   : > { %p1300_p7 = pnand %p1298_p5, %p1295_p3 }
  0x21   : > { %1303 = shalt.err (!%p1300_p7)
}
  0x22   : > { %s1304_s13 = scalar_lea.vmem %s203_s29, 256  ;;  %p1312_p1 = scmp.lt.s32.totalorder %s203_s29, %s203_s29 }
  0x23   : > { %p1305_p9 = scmp.ne.s32.totalorder %s203_s29, %s1304_s13  ;;  %p1313_p4 = scmp.lt.s32.totalorder %s1304_s13, %s1304_s13 }
  0x25   : > { %p1307_p10 = pnand %p1305_p9, %p1293_p13  ;;  %p1314_p8 = por %p1313_p4, %p1312_p1 }
  0x27   : > { %p1308_p6 = pneg %p1307_p10 }
  0x29   : > { %p1315_p2 = pnand %p1314_p8, %p1308_p6 }
  0x2b   : > { %1318 = shalt.err (!%p1315_p2)
}
  0x2c   : > { %s1470_s14 = smov 64   ;;  %s1471_s21 = smov 4  }
  0x2d   : > { %1182 = dma.hbm_to_vmem [thread:$0]  (!%p1580_p11), %s1859_s1, 256, %s203_s29, [#allocation7], %s1470_s14, %s1470_s14, %s1471_s21  }
  0x2e   : > { %p46_p1 = scmp.ge.s32.totalorder %s44_s5, 2  ;;  %s51_s6 = sadd.s32 1, %s1455_s17 }
  0x2f   : > { %p58_p2 = scmp.ne.s32.totalorder %s1455_s17, %s1451_s16  ;;  %p59_p4 = scmp.eq.s32.totalorder %s1467_s20, 0 }
  0x30   : > { %s1888_s5 = smov (%p46_p1, %s44_s5), 0  ;;  %p1874_p8 = scmp.ne.s32.totalorder %s1868_s24, 0 }
  0x31   : > { %p1607_p6 = por %p59_p4, %p58_p2  ;;  %s48_s30 = ssub.s32 %s1463_s19, %s1888_s5 }
  0x32   : > { %p1613_p10 = por %p1874_p8, %p58_p2  ;;  %p1195_p12 = scmp.lt.s32.totalorder %s1467_s20, 2 }
  0x33   : > { %p49_p11 = scmp.eq.s32.totalorder %s48_s30, 0  ;;  %s222_s29 = sand.u32 1, %s1455_s17  }
  0x34   : > { %s1057_s9 = sshll.u32 %s222_s29, 2  ;;  %s1058_s11 = sshll.u32 %s1463_s19, 6 }
  0x35   : > { %s1622_s10 = scalar_select %p49_p11, %s1455_s17, %s51_s6  }
  0x36   : > { %s1628_s14 = scalar_lea.hbm %s1858_s0, %s1058_s11  ;;  %s226_s24 = scalar_lea.vmem [#allocation3], %s1057_s9 }
  0x37   : > { %s233_s21 = sshll.u32 %s226_s24, 4  ;;  %p1634_p13 = pnand %p1195_p12, %p1607_p6  ;;  %s1630_s21 = int_to_ptr.vmem [resolvable:$true] %s233_s21 }
  0x38   : > { %s223_s28 = scalar_lea.sflag [#allocation4], %s222_s29  ;;  %s1319_s6 = scalar_lea.hbm %s1628_s14, 64 }
  0x39   : > { %p1320_p0 = scmp.ne.s32.totalorder %s1628_s14, %s1319_s6  ;;  %p1321_p3 = pneg %p1634_p13 }
  0x3a   : > { %s1324_s11 = scalar_lea.hbm %s1858_s0, 128  ;;  %p1325_p9 = scmp.lt.u32.totalorder %s1628_s14, %s1858_s0 }
  0x3b   : > { %p1322_p5 = pnand %p1321_p3, %p1320_p0  ;;  %p1326_p1 = scmp.lt.u32.totalorder %s1324_s11, %s1319_s6 }
  0x3c   : > { %p1328_p4 = scmp.lt.u32.totalorder %s1319_s6, %s1628_s14 }
  0x3d   : > { %p1323_p7 = pneg %p1322_p5  ;;  %p1327_p2 = por %p1326_p1, %p1325_p9 }
  0x3f   : > { %p1329_p6 = por %p1328_p4, %p1327_p2 }
  0x41   : > { %p1330_p8 = pnand %p1329_p6, %p1323_p7 }
  0x43   : > { %1333 = shalt.err (!%p1330_p8)
}
  0x44   : > { %s1334_s29 = scalar_lea.vmem %s1630_s21, 64  ;;  %s1472_s13 = smov [#allocation3]  }
  0x45   : > { %p1335_p12 = scmp.ne.s32.totalorder %s1630_s21, %s1334_s29  ;;  %s1339_s24 = sshll.u32 %s1472_s13, 4  ;;  %s1340_s24 = int_to_ptr.vmem [resolvable:$false] %s1339_s24 }
  0x46   : > { %s1341_s30 = scalar_lea.vmem %s1340_s24, 128  ;;  %p1342_p5 = scmp.lt.s32.totalorder %s1630_s21, %s1340_s24 }
  0x47   : > { %p1337_p11 = pnand %p1335_p12, %p1321_p3  ;;  %p1343_p9 = scmp.lt.s32.totalorder %s1341_s30, %s1334_s29 }
  0x49   : > { %p1338_p0 = pneg %p1337_p11  ;;  %p1344_p1 = por %p1343_p9, %p1342_p5 }
  0x4b   : > { %p1345_p2 = pnand %p1344_p1, %p1338_p0 }
  0x4d   : > { %1348 = shalt.err (!%p1345_p2)
}
  0x4e   : > { %1186 = dma.hbm_to_vmem [thread:$0]  (!%p1634_p13), %s1628_s14, 64, %s1630_s21, %s223_s28  }
  0x4f   : > { %p1877_p7 = scmp.ne.s32.totalorder %s1871_s27, 0 }
  0x50   : > { %s1666_s6 = sand.u32 (!%p1877_p7), 1, %s1451_s16   ;;  %p1878_p3 = scmp.ne.s32.totalorder (!%p1877_p7), %s1869_s25, 0 }
  0x51   : > { %242 = sbr.rel (%p1877_p7) target bundleno = 1389 (0x56d), region = 32  ;;  %s1060_s9 = sshll.u32 (!%p1877_p7), %s1666_s6, 2 }
  0x52   : > { %s245_s11 = scalar_lea.sflag (!%p1877_p7), [#allocation4], %s1666_s6  ;;  %s248_s7 = scalar_lea.vmem (!%p1877_p7), [#allocation3], %s1060_s9 }
  0x58   : > { %1430 = dma.done.wait (%p1878_p3), %s245_s11, 64  }
  0x59   : > { %1432 = vsyncadd (%p1878_p3), %s245_s11, 4294967232  ;;  %p1879_p4 = scmp.ne.s32.totalorder %s1867_s23, 0 }
  0x5b   : > { %1434 = dma.done.wait (%p1879_p4), [#allocation7], 256  }
  0x5c   : > { %1436 = vsyncadd (%p1879_p4), [#allocation7], 4294967040  ;;  %v1473_v0 = vmov 0.0   ;;  %vm1474_vm0 = vmmov 0   ;;  %v1266_v1 = vld [vmem:[#allocation6] sm:$0xff]   ;;  %v1267_v2 = vld [vmem:[#allocation6 + $0x8] sm:$0xff]  }
  0x5d   : > { %1113 = vmatprep.subr.bf16.mxu0 %v1473_v0  ;;  %1117 = vmatprep.mubr.msk.bf16.mxu0 %vm1474_vm0, %v1473_v0  ;;  %v294_v3 = vld [vmem:[%s248_s7] sm:$0xf]  ;;  %vm318_vm1 = vcmask 261120   ;;  %v1064_v4 = vld [vmem:[%s1860_s2] ss:$0 sm:$0xff]  ;;  %vm363_vm2 = vcmask 781312  }
  0x5e   : > { %1121 = vmatprep.subr.bf16.mxu1 %v1473_v0  ;;  %1123 = vmatprep.mubr.msk.bf16.mxu1 %vm1474_vm0, %v1473_v0  ;;  %s1475_s27 = smov 120   ;;  %s1476_s14 = smov 96   ;;  %vm377_vm3 = vcmask 64512   ;;  %vm436_vm4 = vcmask 60416   ;;  %vm443_vm5 = vcmask 1043456  }
  0x5f   : > { %1114 = vmatpush3.bf16.msra.mxu0 %v1266_v1  ;;  %s1477_s21 = smov 80   ;;  %s1478_s22 = smov 88  }
  0x60   : > { %1115 = vmatprep.subr.bf16.mxu0 %v1473_v0  ;;  %s1479_s28 = smov 72   ;;  %s1480_s12 = smov 112  }
  0x61   : > { %s1481_s29 = smov 104   ;;  %s1482_s13 = smov 56  }
  0x62   : > { %s1483_s24 = smov 64   ;;  %s1484_s30 = smov 40  }
  0x63   : > { %1116 = vmatpush3.bf16.msra.mxu0 %v1267_v2  ;;  %s1485_s9 = smov 48   ;;  %s1063_s11 = sshll.u32 %s1666_s6, 4 }
  0x64   : > { %1127 = vmatprep.subr.bf16.mxu0 %v1473_v0  ;;  %s1734_s7 = scalar_lea.vmem [#allocation9], %s1063_s11  ;;  %s1062_s23 = sshll.u32 %s1666_s6, 3 }
  0x65   : > { %s1762_s25 = scalar_lea.vmem [#allocation8], %s1062_s23 }
  0x66   : > { %1118 = vmatmul.mubr.msk.bf16.vlgmr.msra.gmra.mrb[0].mxu0 %vm318_vm1, %v294_v3 }
  0x67   : > { %1129 = vmatprep.mubr.msk.bf16.mxu0 %vm1474_vm0, %v1473_v0 }
 0x139   : > { %v356_v5 = vpop.f32.mrb[0].mxu0 }
 0x13a   : > { %v357_v6 = vadd.f32 %v1064_v4, %v356_v5  ;;  %v1119_v7 = vpop.f32.mrb[1].mxu0 }
 0x13b   : > { %v359_v8 = vpop.f32.mrb[2].mxu0 }
 0x13c   : > { %v362_v9 = vpack.c.bf16 %v357_v6, %v357_v6  ;;  %v1120_v10 = vpop.f32.mrb[3].mxu0 }
 0x13e   : > { %364 = vst.msk [vmem:[#allocation2] sm:$0xf] %vm363_vm2, %v362_v9 }
 0x145   : > { %v1268_v11 = vld [vmem:[#allocation2] ss:$0 sps:$4 sm:$0xff]  }
 0x146   : > { %v1691_v12 = vld [vmem:[#allocation2] ss:$0 sps:$4 sm:$0xff]   ;;  %493 = vrot.lane.b32.xlu1 %v1268_v11, %s1475_s27  ;;  %s1486_s27 = smov 8  }
 0x147   : > { %375 = vrot.lane.b32.xlu0 %v1691_v12, %s1476_s14  ;;  %v1694_v13 = vld [vmem:[#allocation2] ss:$0 sps:$4 sm:$0xff]   ;;  %s1093_s14 = sshll.u32 %s1459_s18, 8 }
 0x148   : > { %v1696_v14 = vld [vmem:[#allocation2] ss:$0 sps:$4 sm:$0xff]  }
 0x149   : > { %v1700_v15 = vld [vmem:[#allocation2] ss:$0 sps:$4 sm:$0xff]  }
 0x14a   : > { %624 = vrot.lane.b32.xlu1 %v1694_v13, %s1477_s21  ;;  %v1273_v16 = vld [vmem:[#allocation2] ss:$0 sps:$4 sm:$0xff]   ;;  %s903_s21 = sshll.u32 %s1734_s7, 4  ;;  %s1773_s21 = int_to_ptr.vmem [resolvable:$true] %s903_s21 }
 0x14b   : > { %498 = vrot.lane.b32.xlu0 %v1696_v14, %s1478_s22  ;;  %v1274_v17 = vld [vmem:[#allocation2] ss:$0 sps:$4 sm:$0xff]  }
 0x14c   : > { %v370_v22 = vld [vmem:[#allocation2] sm:$0xf] }
 0x14e   : > { %750 = vrot.lane.b32.xlu1 %v1700_v15, %s1479_s28 }
 0x14f   : > { %619 = vrot.lane.b32.xlu0 %v1273_v16, %s1480_s12  ;;  %s1771_s12 = scalar_lea.hbm %s1862_s4, %s1093_s14 }
 0x153   : > { %745 = vrot.lane.b32.xlu0 %v1274_v17, %s1481_s29  ;;  %s1487_s29 = smov 16  }
 0x1b8   : > { %v494_v21 = vpop.permute.xlu1 %493 }
 0x1b9   : > { %v376_v18 = vpop.permute.xlu0 %375 }
 0x1ba   : > { %v382_v19 = vsel %vm377_vm3, %v376_v18, 0 }
 0x1bb   : > { %1122 = vmatpush3.bf16.xpose.msra.mxu1 %v382_v19 }
 0x1bc   : > { %1133 = vmatprep.subr.bf16.mxu1 %v1473_v0  ;;  %v625_v24 = vpop.permute.xlu1 %624 }
 0x1bd   : > { %v499_v20 = vpop.permute.xlu0 %498  ;;  %v630_v25 = vsel %vm377_vm3, %v625_v24, 0 }
 0x1be   : > { %v504_v23 = vsel %vm377_vm3, %v499_v20, 0 }
 0x1c0   : > { %v751_v26 = vpop.permute.xlu1 %750 }
 0x1c1   : > { %v620_v27 = vpop.permute.xlu0 %619  ;;  %v756_v28 = vsel %vm377_vm3, %v751_v26, 0 }
 0x1c2   : > { %1124 = vmatmul.mubr.msk.bf16.vlgmr.msra.gmra.mrb[0].mxu1 %vm377_vm3, %v370_v22 }
 0x1c3   : > { %1134 = vmatpush3.bf16.xpose.msra.mxu1 %v504_v23  ;;  %1135 = vmatprep.mubr.msk.bf16.mxu1 %vm1474_vm0, %v1473_v0 }
 0x1c4   : > { %1145 = vmatprep.subr.bf16.mxu1 %v1473_v0 }
 0x1c5   : > { %v746_v29 = vpop.permute.xlu0 %745 }
 0x1ca   : > { %1136 = vmatmul.mubr.msk.bf16.vlgmr.msra.gmra.mrb[4].mxu1 %vm377_vm3, %v494_v21 }
 0x1cb   : > { %1146 = vmatpush3.bf16.xpose.msra.mxu1 %v630_v25  ;;  %1147 = vmatprep.mubr.msk.bf16.mxu1 %vm1474_vm0, %v1473_v0 }
 0x1cc   : > { %1157 = vmatprep.subr.bf16.mxu1 %v1473_v0 }
 0x1d2   : > { %1148 = vmatmul.mubr.msk.bf16.vlgmr.msra.gmra.mrb[8].mxu1 %vm377_vm3, %v620_v27 }
 0x1d3   : > { %1158 = vmatpush3.bf16.xpose.msra.mxu1 %v756_v28  ;;  %1159 = vmatprep.mubr.msk.bf16.mxu1 %vm1474_vm0, %v1473_v0 }
 0x1da   : > { %1160 = vmatmul.mubr.msk.bf16.vlgmr.msra.gmra.mrb[12].mxu1 %vm377_vm3, %v746_v29 }
 0x295   : > { %v418_v30 = vpop.f32.mrb[0].mxu1 }
 0x296   : > { %v1125_v31 = vpop.f32.mrb[1].mxu1  ;;  %v424_v32 = vsel %vm377_vm3, %v418_v30, -inf }
 0x297   : > { %425 = vmax.xlane.f32.xlu1 %v424_v32  ;;  %v421_v33 = vpop.f32.mrb[2].mxu1 }
 0x298   : > { %v1126_v34 = vpop.f32.mrb[3].mxu1 }
 0x29d   : > { %v540_v35 = vpop.f32.mrb[4].mxu1 }
 0x29e   : > { %v1137_v36 = vpop.f32.mrb[5].mxu1  ;;  %v546_v37 = vsel %vm377_vm3, %v540_v35, -inf }
 0x29f   : > { %547 = vmax.xlane.f32.xlu0 %v546_v37  ;;  %v543_v38 = vpop.f32.mrb[6].mxu1 }
 0x2a0   : > { %v1138_v39 = vpop.f32.mrb[7].mxu1 }
 0x2a5   : > { %v666_v40 = vpop.f32.mrb[8].mxu1 }
 0x2a6   : > { %v1149_v41 = vpop.f32.mrb[9].mxu1  ;;  %v672_v42 = vsel %vm377_vm3, %v666_v40, -inf }
 0x2a7   : > { %673 = vmax.xlane.f32.xlu0 %v672_v42  ;;  %v669_v43 = vpop.f32.mrb[10].mxu1 }
 0x2a8   : > { %v1150_v44 = vpop.f32.mrb[11].mxu1 }
 0x2ad   : > { %v792_v45 = vpop.f32.mrb[12].mxu1 }
 0x2ae   : > { %v1161_v46 = vpop.f32.mrb[13].mxu1  ;;  %v798_v47 = vsel %vm377_vm3, %v792_v45, -inf }
 0x2af   : > { %799 = vmax.xlane.f32.xlu1 %v798_v47  ;;  %v795_v48 = vpop.f32.mrb[14].mxu1 }
 0x2b0   : > { %v1162_v49 = vpop.f32.mrb[15].mxu1 }
 0x324   : > { %v426_v50 = vpop.xlane.xlu1 %425 }
 0x325   : > { %v427_v51 = vsub.f32 %v418_v30, %v426_v50 }
 0x327   : > { %v428_v52 = vmul.f32 1.442695, %v427_v51 }
 0x329   : > { %1275 = vpow2.f32 %v428_v52 }
 0x32c   : > { %v548_v53 = vpop.xlane.xlu0 %547 }
 0x32d   : > { %v549_v54 = vsub.f32 %v540_v35, %v548_v53 }
 0x32f   : > { %v550_v55 = vmul.f32 1.442695, %v549_v54 }
 0x331   : > { %1277 = vpow2.f32 %v550_v55 }
 0x333   : > { %v1276_v56 = vpop.eup %1275 }
 0x334   : > { %v674_v57 = vpop.xlane.xlu0 %673  ;;  %v430_v58 = vsel %vm377_vm3, %v1276_v56, 0.0 }
 0x335   : > { %v675_v59 = vsub.f32 %v666_v40, %v674_v57  ;;  %431 = vadd.xlane.f32.xlu0 %v430_v58 }
 0x337   : > { %v676_v60 = vmul.f32 1.442695, %v675_v59 }
 0x339   : > { %1279 = vpow2.f32 %v676_v60 }
 0x33b   : > { %v1278_v61 = vpop.eup %1277 }
 0x33c   : > { %v552_v62 = vsel %vm377_vm3, %v1278_v61, 0.0  ;;  %v800_v2 = vpop.xlane.xlu1 %799 }
 0x33d   : > { %553 = vadd.xlane.f32.xlu1 %v552_v62  ;;  %v801_v3 = vsub.f32 %v792_v45, %v800_v2 }
 0x33f   : > { %v802_v4 = vmul.f32 1.442695, %v801_v3 }
 0x341   : > { %1281 = vpow2.f32 %v802_v4 }
 0x343   : > { %v1280_v63 = vpop.eup %1279 }
 0x344   : > { %v678_v1 = vsel %vm377_vm3, %v1280_v63, 0.0 }
 0x345   : > { %679 = vadd.xlane.f32.xlu0 %v678_v1 }
 0x34b   : > { %v1282_v5 = vpop.eup %1281 }
 0x34c   : > { %v804_v6 = vsel %vm377_vm3, %v1282_v5, 0.0 }
 0x34e   : > { %560 = vrot.lane.b32.xlu1 %v1696_v14, %s1482_s13  ;;  %s872_s13 = scalar_lea.sflag [#allocation10], %s1666_s6 }
 0x35b   : > { %438 = vrot.lane.b32.xlu0 %v1691_v12, %s1483_s24 }
 0x35f   : > { %812 = vrot.lane.b32.xlu0 %v1700_v15, %s1484_s30  ;;  %s1349_s30 = scalar_lea.vmem %s1773_s21, 256 }
 0x360   : > { %p1350_p13 = scmp.ne.s32.totalorder %s1773_s21, %s1349_s30 }
 0x362   : > { %p1351_p6 = pnand %p1350_p13, %p1613_p10 }
 0x364   : > { %p1352_p8 = pneg %p1351_p6 }
 0x372   : > { %805 = vadd.xlane.f32.xlu1 %v804_v6 }
 0x383   : > { %686 = vrot.lane.b32.xlu1 %v1694_v13, %s1485_s9  ;;  %s1488_s9 = smov [#allocation9]  }
 0x384   : > { %s1353_s11 = sshll.u32 %s1488_s9, 4  ;;  %s1354_s11 = int_to_ptr.vmem [resolvable:$false] %s1353_s11 }
 0x385   : > { %p1356_p12 = scmp.lt.s32.totalorder %s1773_s21, %s1354_s11 }
 0x3c2   : > { %v432_v7 = vpop.xlane.xlu0 %431 }
 0x3c3   : > { %1283 = vrcp.f32 %v432_v7 }
 0x3ca   : > { %v554_v8 = vpop.xlane.xlu1 %553 }
 0x3cb   : > { %1285 = vrcp.f32 %v554_v8 }
 0x3cd   : > { %v1284_v9 = vpop.eup %1283 }
 0x3ce   : > { %v434_v10 = vmul.f32 %v1284_v9, %v1276_v56  ;;  %v561_v17 = vpop.permute.xlu1 %560 }
 0x3cf   : > { %v566_v19 = vsel %vm443_vm5, %v561_v17, 0 }
 0x3d0   : > { %v435_v11 = vpack.c.bf16 %v434_v10, %v434_v10 }
 0x3d2   : > { %v680_v12 = vpop.xlane.xlu0 %679  ;;  %437 = vst.msk [vmem:[%s1734_s7] sm:$0xf] %vm436_vm4, %v435_v11 }
 0x3d3   : > { %1287 = vrcp.f32 %v680_v12 }
 0x3d5   : > { %v1286_v14 = vpop.eup %1285 }
 0x3d6   : > { %v556_v15 = vmul.f32 %v1286_v14, %v1278_v61  ;;  %v439_v13 = vpop.permute.xlu0 %438 }
 0x3d7   : > { %v445_v16 = vsel %vm443_vm5, %v439_v13, 0 }
 0x3d8   : > { %1128 = vmatpush3.bf16.msra.mxu0 %v445_v16  ;;  %v557_v18 = vpack.c.bf16 %v556_v15, %v556_v15 }
 0x3d9   : > { %1139 = vmatprep.subr.bf16.mxu0 %v1473_v0 }
 0x3da   : > { %1074 = vst.msk [vmem:[%s1734_s7 + $0x4] sm:$0xf] %vm436_vm4, %v557_v18  ;;  %v813_v26 = vpop.permute.xlu0 %812 }
 0x3db   : > { %1130 = vmatmul.mubr.msk.bf16.vlgmr.msra.gmra.mrb[4].mxu0 %vm377_vm3, %v435_v11  ;;  %v818_v27 = vsel %vm443_vm5, %v813_v26, 0 }
 0x3dc   : > { %1140 = vmatpush3.bf16.msra.mxu0 %v566_v19  ;;  %1141 = vmatprep.mubr.msk.bf16.mxu0 %vm1474_vm0, %v1473_v0 }
 0x3dd   : > { %v1288_v20 = vpop.eup %1287  ;;  %1151 = vmatprep.subr.bf16.mxu0 %v1473_v0 }
 0x3de   : > { %v682_v21 = vmul.f32 %v1288_v20, %v1280_v63 }
 0x3e0   : > { %v683_v22 = vpack.c.bf16 %v682_v21, %v682_v21 }
 0x3e2   : > { %1079 = vst.msk [vmem:[%s1734_s7 + $0x8] sm:$0xf] %vm436_vm4, %v683_v22 }
 0x3e3   : > { %1142 = vmatmul.mubr.msk.bf16.vlgmr.msra.gmra.mrb[8].mxu0 %vm377_vm3, %v557_v18 }
 0x3e4   : > { %1153 = vmatprep.mubr.msk.bf16.mxu0 %vm1474_vm0, %v1473_v0 }
 0x3ff   : > { %v806_v23 = vpop.xlane.xlu1 %805 }
 0x400   : > { %1289 = vrcp.f32 %v806_v23 }
 0x403   : > { %v687_v24 = vpop.permute.xlu1 %686 }
 0x404   : > { %v692_v25 = vsel %vm443_vm5, %v687_v24, 0 }
 0x405   : > { %1152 = vmatpush3.bf16.msra.mxu0 %v692_v25 }
 0x406   : > { %1163 = vmatprep.subr.bf16.mxu0 %v1473_v0 }
 0x408   : > { %1154 = vmatmul.mubr.msk.bf16.vlgmr.msra.gmra.mrb[12].mxu0 %vm377_vm3, %v683_v22 }
 0x409   : > { %1164 = vmatpush3.bf16.msra.mxu0 %v818_v27  ;;  %1165 = vmatprep.mubr.msk.bf16.mxu0 %vm1474_vm0, %v1473_v0 }
 0x40a   : > { %v1290_v28 = vpop.eup %1289 }
 0x40b   : > { %v808_v29 = vmul.f32 %v1290_v28, %v1282_v5 }
 0x40d   : > { %v809_v30 = vpack.c.bf16 %v808_v29, %v808_v29 }
 0x40f   : > { %1084 = vst.msk [vmem:[%s1734_s7 + $0xc] sm:$0xf] %vm436_vm4, %v809_v30  ;;  %s1355_s7 = scalar_lea.vmem %s1354_s11, 512 }
 0x410   : > { %1166 = vmatmul.mubr.msk.bf16.vlgmr.msra.gmra.mrb[16].mxu0 %vm377_vm3, %v809_v30  ;;  %p1357_p11 = scmp.lt.s32.totalorder %s1355_s7, %s1349_s30 }
 0x412   : > { %p1358_p0 = por %p1357_p11, %p1356_p12 }
 0x414   : > { %p1359_p5 = pnand %p1358_p0, %p1352_p8 }
 0x4ae   : > { %v481_v31 = vpop.f32.mrb[4].mxu0 }
 0x4af   : > { %487 = vst.msk [vmem:[%s1762_s25] sm:$0xff] %vm377_vm3, %v481_v31  ;;  %v1131_v32 = vpop.f32.mrb[5].mxu0 }
 0x4b0   : > { %v484_v33 = vpop.f32.mrb[6].mxu0 }
 0x4b1   : > { %v1132_v34 = vpop.f32.mrb[7].mxu0 }
 0x4b6   : > { %v602_v0 = vpop.f32.mrb[8].mxu0 }
 0x4b7   : > { %609 = vrot.lane.b32.xlu1 %v602_v0, %s1486_s27  ;;  %v1143_v35 = vpop.f32.mrb[9].mxu0 }
 0x4b8   : > { %v605_v36 = vpop.f32.mrb[10].mxu0 }
 0x4b9   : > { %v1144_v37 = vpop.f32.mrb[11].mxu0 }
 0x4db   : > { %v728_v38 = vpop.f32.mrb[12].mxu0 }
 0x4dc   : > { %735 = vrot.lane.b32.xlu0 %v728_v38, %s1487_s29  ;;  %v1155_v39 = vpop.f32.mrb[13].mxu0 }
 0x4dd   : > { %v731_v40 = vpop.f32.mrb[14].mxu0 }
 0x4de   : > { %1362 = shalt.err (!%p1359_p5)
}
 0x4df   : > { %s1363_s23 = scalar_lea.hbm %s1771_s12, 256  ;;  %s1367_s22 = scalar_lea.hbm %s1862_s4, 512 }
 0x4e0   : > { %p1364_p9 = scmp.ne.s32.totalorder %s1771_s12, %s1363_s23  ;;  %p1368_p7 = scmp.lt.u32.totalorder %s1771_s12, %s1862_s4 }
 0x4e1   : > { %p1369_p3 = scmp.lt.u32.totalorder %s1367_s22, %s1363_s23  ;;  %p1371_p13 = scmp.lt.u32.totalorder %s1363_s23, %s1771_s12 }
 0x4e2   : > { %p1365_p1 = pnand %p1364_p9, %p1613_p10 }
 0x4e3   : > { %p1370_p4 = por %p1369_p3, %p1368_p7 }
 0x4e4   : > { %p1366_p2 = pneg %p1365_p1 }
 0x4e5   : > { %p1372_p6 = por %p1371_p13, %p1370_p4 }
 0x4e7   : > { %p1373_p8 = pnand %p1372_p6, %p1366_p2 }
 0x4e9   : > { %1376 = shalt.err (!%p1373_p8)
}
 0x4ea   : > { %s1489_s30 = smov 4   ;;  %v1156_v41 = vpop.f32.mrb[15].mxu0  ;;  %s1490_s9 = smov 24   ;;  %vm612_vm6 = vcmask 130112   ;;  %vm738_vm7 = vcmask 195712   ;;  %vm864_vm8 = vcmask 261312  }
 0x4eb   : > { %1176 = dma.vmem_to_hbm [thread:$0]  (%p1613_p10), %s1773_s21, 256, %s1771_s12, %s872_s13, %s1483_s24, %s1483_s24, %s1489_s30   ;;  %v854_v42 = vpop.f32.mrb[16].mxu0 }
 0x4ec   : > { %861 = vrot.lane.b32.xlu1 %v854_v42, %s1490_s9  ;;  %v1167_v43 = vpop.f32.mrb[17].mxu0  ;;  %s1088_s11 = sshll.u32 %s1459_s18, 7  ;;  %s887_s7 = sshll.u32 %s1762_s25, 4  ;;  %s1810_s7 = int_to_ptr.vmem [resolvable:$true] %s887_s7 }
 0x4ed   : > { %v857_v44 = vpop.f32.mrb[18].mxu0  ;;  %s1808_s12 = scalar_lea.hbm %s1861_s3, %s1088_s11  ;;  %s867_s13 = scalar_lea.sflag [#allocation5], %s1666_s6 }
 0x4ee   : > { %v1168_v45 = vpop.f32.mrb[19].mxu0  ;;  %s1377_s23 = scalar_lea.vmem %s1810_s7, 128  ;;  %s1491_s18 = smov [#allocation8]  }
 0x4ef   : > { %p1378_p12 = scmp.ne.s32.totalorder %s1810_s7, %s1377_s23  ;;  %s1381_s27 = sshll.u32 %s1491_s18, 4  ;;  %s1382_s27 = int_to_ptr.vmem [resolvable:$false] %s1381_s27 }
 0x4f0   : > { %s1383_s14 = scalar_lea.vmem %s1382_s27, 256  ;;  %p1384_p5 = scmp.lt.s32.totalorder %s1810_s7, %s1382_s27 }
 0x4f1   : > { %p1379_p11 = pnand %p1378_p12, %p1613_p10  ;;  %p1385_p9 = scmp.lt.s32.totalorder %s1383_s14, %s1377_s23 }
 0x4f3   : > { %p1380_p0 = pneg %p1379_p11  ;;  %p1386_p1 = por %p1385_p9, %p1384_p5 }
 0x4f5   : > { %p1387_p2 = pnand %p1386_p1, %p1380_p0 }
 0x529   : > { %v610_v46 = vpop.permute.xlu1 %609 }
 0x52a   : > { %613 = vst.msk [vmem:[%s1762_s25] sm:$0xff] %vm612_vm6, %v610_v46 }
 0x54e   : > { %v736_v47 = vpop.permute.xlu0 %735 }
 0x54f   : > { %739 = vst.msk [vmem:[%s1762_s25] sm:$0xff] %vm738_vm7, %v736_v47 }
 0x55e   : > { %v862_v48 = vpop.permute.xlu1 %861 }
 0x55f   : > { %865 = vst.msk [vmem:[%s1762_s25] sm:$0xff] %vm864_vm8, %v862_v48 }
 0x560   : > { %1390 = shalt.err (!%p1387_p2)
}
 0x561   : > { %s1391_s6 = scalar_lea.hbm %s1808_s12, 128  ;;  %s1395_s28 = scalar_lea.hbm %s1861_s3, 256 }
 0x562   : > { %p1392_p7 = scmp.ne.s32.totalorder %s1808_s12, %s1391_s6  ;;  %p1396_p13 = scmp.lt.u32.totalorder %s1808_s12, %s1861_s3 }
 0x563   : > { %p1397_p6 = scmp.lt.u32.totalorder %s1395_s28, %s1391_s6  ;;  %p1399_p12 = scmp.lt.u32.totalorder %s1391_s6, %s1808_s12 }
 0x564   : > { %p1393_p3 = pnand %p1392_p7, %p1613_p10 }
 0x565   : > { %p1398_p8 = por %p1397_p6, %p1396_p13 }
 0x566   : > { %p1394_p4 = pneg %p1393_p3 }
 0x567   : > { %p1400_p11 = por %p1399_p12, %p1398_p8 }
 0x569   : > { %p1401_p0 = pnand %p1400_p11, %p1394_p4 }
 0x56b   : > { %1404 = shalt.err (!%p1401_p0)
}
 0x56c   : > { %1175 = dma.vmem_to_hbm [thread:$0]  (%p1613_p10), %s1810_s7, 128, %s1808_s12, %s867_s13  }
 0x56d PF: > { %s918_s9 = sand.u32 1, %s1447_s15   ;;  %p1880_p5 = scmp.ne.s32.totalorder %s1870_s26, 0 }
 0x56e   : > { %p1881_p9 = scmp.ge.s32.totalorder %s1467_s20, 2  ;;  %s919_s11 = scalar_lea.sflag [#allocation5], %s918_s9 }
 0x570   : > { %p1188_p1 = pnand %p1881_p9, %p1880_p5 }
 0x572   : > { %1438 = dma.done.wait (!%p1188_p1), %s919_s11, 128  }
 0x573   : > { %1440 = vsyncadd (!%p1188_p1), %s919_s11, 4294967168  ;;  %s928_s24 = scalar_lea.sflag [#allocation10], %s918_s9 }
 0x574   : > { %1442 = dma.done.wait (!%p1188_p1), %s928_s24, 256  }
 0x575   : > { %1444 = vsyncadd (!%p1188_p1), %s928_s24, 4294967040  ;;  %s25_s20 = sadd.s32 1, %s1467_s20   ;;  %s1882_s15 = smov %s1451_s16 }
 0x576   : > { %p22_p2 = scmp.ge.s32.totalorder %s25_s20, 4   ;;  %s1883_s16 = smov %s1455_s17 }
 0x577   : > { %s1884_s17 = smov %s1622_s10  ;;  %s1885_s18 = smov %s1463_s19 }
 0x578   : > { %s1886_s19 = smov %s1888_s5  ;;  %24 = sbr.rel (!%p22_p2) target bundleno = 9 (0x9), region = 110 }
 0x57f   :  { %933 = vsyncpa [#allocation4], 1 }
 0x580   :  { %935 = vsyncpa [#allocation4 + $0x1], 1 }
 0x581   :  { %936 = vsyncpa [#allocation7], 1 }
 0x582   :  { %937 = vsyncpa [#allocation5], 1 }
 0x583   :  { %939 = vsyncpa [#allocation5 + $0x1], 1 }
 0x584   :  { %940 = vsyncpa [#allocation10], 1 }
 0x585   :  { %942 = vsyncpa [#allocation10 + $0x1], 1 }

</bundles_post_ra>
